<compile_context>
chip_gen: v6e
topology: v6e:2x2x1
jax: 0.10.0
libtpu: 0.0.40
codegen_flags: <defaults>
</compile_context>

<pallas_src>
import functools

import jax
import jax.numpy as jnp
from jax import lax
from jax.experimental import pallas as pl
from jax.experimental.pallas import tpu as pltpu


def _mean_pool_kernel(x_ref, o_ref, *scratch, s_total, tile_s, needs_s_mask):
    # x_ref:   (TB, TS, D) input tile
    # o_ref:   (TB, D)     output tile (resident across the k axis)
    # scratch: optional (TB, D) f32 accumulator (only for low-precision dtypes)
    acc_ref = scratch[0] if scratch else o_ref
    k = pl.program_id(1)
    k_last = pl.num_programs(1) - 1

    @pl.when(k == 0)
    def _():
        acc_ref[...] = jnp.zeros_like(acc_ref)

    if needs_s_mask:
        # Only the final set tile has padded rows; keep every interior step at
        # a single add/element so the kernel remains HBM-bound.
        @pl.when(k != k_last)
        def _():
            acc_ref[...] += jnp.sum(x_ref[...], axis=1, dtype=jnp.float32)

        @pl.when(k == k_last)
        def _():
            # Slim (1, TS, 1) sublane mask, broadcast by jnp.where -> no
            # full-tile int32 iota (keeps vreg pressure down).
            row = lax.broadcasted_iota(jnp.int32, (1, tile_s, 1), 1)
            valid = row < (s_total - k * tile_s)
            x = jnp.where(valid, x_ref[...], jnp.zeros((), x_ref.dtype))
            acc_ref[...] += jnp.sum(x, axis=1, dtype=jnp.float32)
    else:
        acc_ref[...] += jnp.sum(x_ref[...], axis=1, dtype=jnp.float32)

    @pl.when(k == k_last)
    def _():
        o_ref[...] = (acc_ref[...] * (1.0 / s_total)).astype(o_ref.dtype)


def _chip_defaults():
    """(per-buffer tile byte budget, vmem_limit_bytes) per TPU generation."""
    kind = ""
    try:
        kind = jax.devices()[0].device_kind.lower()
    except Exception:
        pass
    if "v7" in kind:
        # Fast HBM (~3.2 TB/s): big tiles to amortize the ~0.35us step overhead,
        # but stay well under the 64 MiB physical VMEM.
        return 8 << 20, 48 << 20
    if "v6" in kind:
        return 4 << 20, 48 << 20
    # v5e (16 MiB scoped default, 128 MiB physical) and unknown chips.
    return 4 << 20, 32 << 20


def _choose_tiles(B, S, D, itemsize, target_bytes):
    """Pick (TB, TS) so the input block is ~target_bytes, dtype/layout aware."""
    # Sublane multiple per dtype width (packed rows for sub-32-bit dtypes).
    sub = {4: 8, 2: 16, 1: 32}.get(itemsize, 8)

    # Batch tile (output second-minor dim): multiple of `sub` for dense stores.
    if B <= sub:
        tb = B
    else:
        tb = max(sub, (min(B, 64) // sub) * sub)
        # Expose >= 2 parallel batch blocks so both v7x TensorCores get work;
        # near-neutral on single-TC chips.
        if pl.cdiv(B, tb) < 2 and B >= 2 * sub:
            tb = max(sub, ((B // 2) // sub) * sub)

    # Large-D guard: never let the minimum TS=sub overshoot the byte budget.
    while tb > sub and tb * sub * D * itemsize > target_bytes:
        tb -= sub

    # Set tile (input second-minor dim): as many rows as fit in the budget.
    ts = target_bytes // max(1, tb * D * itemsize)
    if ts >= S:
        ts = S
    else:
        ts = max(sub, (ts // sub) * sub)
        # Prefer a nearby TS that divides S so the tail mask can be dropped.
        cand = ts
        while cand >= max(sub, (ts * 3) // 4):
            if S % cand == 0:
                ts = cand
                break
            cand -= sub
    return tb, ts


def mean_pool_sets(x, *, tile_b=None, tile_s=None):
    """Mean over axis=1 of x with shape (B, S, D)."""
    B, S, D = x.shape
    itemsize = jnp.dtype(x.dtype).itemsize
    target_bytes, vmem_limit = _chip_defaults()
    tb_auto, ts_auto = _choose_tiles(B, S, D, itemsize, target_bytes)
    tb = tile_b if tile_b is not None else tb_auto
    ts = tile_s if tile_s is not None else ts_auto

    # f32: accumulate straight into the (k-resident) output block, no scratch.
    use_scratch = x.dtype != jnp.float32
    scratch_shapes = [pltpu.VMEM((tb, D), jnp.float32)] if use_scratch else []

    kernel = functools.partial(
        _mean_pool_kernel,
        s_total=S,
        tile_s=ts,
        needs_s_mask=(S % ts != 0),
    )

    return pl.pallas_call(
        kernel,
        out_shape=jax.ShapeDtypeStruct((B, D), x.dtype),
        grid_spec=pltpu.PrefetchScalarGridSpec(
            num_scalar_prefetch=0,
            grid=(pl.cdiv(B, tb), pl.cdiv(S, ts)),
            in_specs=[pl.BlockSpec((tb, ts, D), lambda b, k: (b, k, 0))],
            out_specs=pl.BlockSpec((tb, D), lambda b, k: (b, 0)),
            scratch_shapes=scratch_shapes,
        ),
        compiler_params=pltpu.CompilerParams(
            # Batch blocks are independent (megacore-shardable); the set axis
            # carries the accumulator so it must stay "arbitrary".
            dimension_semantics=("parallel", "arbitrary"),
            vmem_limit_bytes=vmem_limit,
        ),
        cost_estimate=pl.CostEstimate(
            flops=B * S * D,
            transcendentals=0,
            bytes_accessed=(B * S * D + B * D) * itemsize,
        ),
    )(x)


if __name__ == "__main__":
    key = jax.random.PRNGKey(0)
    B, S, D = 16, 64, 128
    x = jax.random.normal(key, (B, S, D), dtype=jnp.float32)

    ref = jnp.mean(x, axis=1)

    # Default (auto-chosen) tiling.
    out = jax.block_until_ready(mean_pool_sets(x))
    assert out.shape == (B, D)
    assert jnp.allclose(out, ref, atol=1e-5, rtol=1e-5)

    # Multi-step reduction with a set tail (exercises the gated mask path:
    # S=64, TS=24 -> 3 k-steps, last one masked).
    out_tiled = jax.block_until_ready(mean_pool_sets(x, tile_b=8, tile_s=24))
    assert jnp.allclose(out_tiled, ref, atol=1e-5, rtol=1e-5)

    # Low-precision input -> f32 VMEM scratch accumulator path, no mask.
    xb = x.astype(jnp.bfloat16)
    out_bf16 = jax.block_until_ready(mean_pool_sets(xb, tile_b=16, tile_s=16))
    ref_bf16 = jnp.mean(xb.astype(jnp.float32), axis=1)
    assert jnp.allclose(out_bf16.astype(jnp.float32), ref_bf16, atol=2e-2, rtol=2e-2)

    print("KERNEL_OK")
</pallas_src>

<mosaic_0001>
module attributes {stable_mosaic.version = 11 : i64} {
  func.func @_mean_pool_kernel(%arg0: i32, %arg1: i32, %arg2: memref<8x64x128xf32, #tpu.memory_space<vmem>>, %arg3: memref<8x128xf32, #tpu.memory_space<vmem>>) attributes {dimension_semantics = [#tpu.dimension_semantics<parallel>, #tpu.dimension_semantics<arbitrary>], iteration_bounds = array<i64: 2, 1>, scalar_prefetch = 0 : i64, scratch_operands = 0 : i64, tpu.core_type = #tpu.core_type<tc>, window_params = [{transform_indices = @transform_0, window_bounds = array<i64: 8, 64, 128>}, {transform_indices = @transform_1, window_bounds = array<i64: 8, 128>}]} {
    %c0_i32 = arith.constant 0 : i32
    %0 = arith.cmpi eq, %arg1, %c0_i32 : i32
    %1 = arith.extui %0 : i1 to i32
    %c0_i32_0 = arith.constant 0 : i32
    %2 = arith.cmpi ne, %1, %c0_i32_0 : i32
    scf.if %2 {
      %cst_9 = arith.constant 0.000000e+00 : f32
      %11 = vector.broadcast %cst_9 : f32 to vector<8x128xf32>
      %c0_10 = arith.constant 0 : index
      %c0_11 = arith.constant 0 : index
      %12 = vector.load %arg3[%c0_10, %c0_11] : memref<8x128xf32, #tpu.memory_space<vmem>>, vector<8x128xf32>
      tpu.vector_store %arg3[%c0_10, %c0_11], %11 {strides = array<i32>} : memref<8x128xf32, #tpu.memory_space<vmem>>, vector<8x128xf32>,
    } else {
    }
    %c0 = arith.constant 0 : index
    %c0_1 = arith.constant 0 : index
    %3 = vector.load %arg3[%c0, %c0_1] : memref<8x128xf32, #tpu.memory_space<vmem>>, vector<8x128xf32>
    %c0_2 = arith.constant 0 : index
    %c0_3 = arith.constant 0 : index
    %c0_4 = arith.constant 0 : index
    %4 = vector.load %arg2[%c0_2, %c0_3, %c0_4] : memref<8x64x128xf32, #tpu.memory_space<vmem>>, vector<8x64x128xf32>
    %cst = arith.constant dense<0.000000e+00> : vector<8x128xf32>
    %5 = vector.multi_reduction <add>, %4, %cst [1] : vector<8x64x128xf32> to vector<8x128xf32>
    %6 = arith.addf %3, %5 : vector<8x128xf32>
    %c0_5 = arith.constant 0 : index
    %c0_6 = arith.constant 0 : index
    %7 = vector.load %arg3[%c0_5, %c0_6] : memref<8x128xf32, #tpu.memory_space<vmem>>, vector<8x128xf32>
    tpu.vector_store %arg3[%c0_5, %c0_6], %6 {strides = array<i32>} : memref<8x128xf32, #tpu.memory_space<vmem>>, vector<8x128xf32>,
    %c0_i32_7 = arith.constant 0 : i32
    %8 = arith.cmpi eq, %arg1, %c0_i32_7 : i32
    %9 = arith.extui %8 : i1 to i32
    %c0_i32_8 = arith.constant 0 : i32
    %10 = arith.cmpi ne, %9, %c0_i32_8 : i32
    scf.if %10 {
      %c0_9 = arith.constant 0 : index
      %c0_10 = arith.constant 0 : index
      %11 = vector.load %arg3[%c0_9, %c0_10] : memref<8x128xf32, #tpu.memory_space<vmem>>, vector<8x128xf32>
      %cst_11 = arith.constant 1.562500e-02 : f32
      %12 = vector.broadcast %cst_11 : f32 to vector<8x128xf32>
      %13 = arith.mulf %11, %12 : vector<8x128xf32>
      %c0_12 = arith.constant 0 : index
      %c0_13 = arith.constant 0 : index
      %14 = vector.load %arg3[%c0_12, %c0_13] : memref<8x128xf32, #tpu.memory_space<vmem>>, vector<8x128xf32>
      tpu.vector_store %arg3[%c0_12, %c0_13], %13 {strides = array<i32>} : memref<8x128xf32, #tpu.memory_space<vmem>>, vector<8x128xf32>,
    } else {
    }
    return
  }
  func.func @transform_0(%arg0: i32, %arg1: i32) -> (i32, i32, i32) {
    %c0_i32 = arith.constant 0 : i32
    %c0_i32_0 = arith.constant 0 : i32
    return %arg0, %arg1, %c0_i32 : i32, i32, i32
  }
  func.func @transform_1(%arg0: i32, %arg1: i32) -> (i32, i32) {
    %c0_i32 = arith.constant 0 : i32
    %c0_i32_0 = arith.constant 0 : i32
    return %arg0, %c0_i32 : i32, i32
  }
}

</mosaic_0001>

<bundles_post_ra>
// kernel: tpu_custom_call.1
= control target key start
LH: loop header
LB: loop body
LE: loop exit
PB: predicated region body
PF: predicated region fallthrough
CT: control target
= control target key end

     0   :  { %6 = vsyncpa [#allocation3], 0  ;;  %s859_s0 = inlined_call_operand.hbm [shape: f32[16,64,128], index: 0, kind: input, shape index: {}]   ;;  %s860_s1 = inlined_call_operand.hbm [shape: f32[16,128], index: 1, kind: output, shape index: {}]  }
   0x1   :  { %8 = vsyncpa [#allocation3 + $0x1], 0 }
   0x2   :  { %9 = vsyncpa [#allocation4], 0 }
   0x3   :  { %11 = vsyncpa [#allocation4 + $0x1], 0  ;;  %s660_s6 = smov 0   ;;  %s662_s7 = smov 0  }
   0x4   :  { %s664_s8 = smov 0   ;;  %s666_s9 = smov 0  }
   0x5   :  { %s668_s10 = smov 0   ;;  %s670_s11 = smov 0  }
   0x6 LB: > { %s454_s12 = sadd.s32 4294967295, %s644_s11   ;;  %s455_s13 = sadd.s32 4294967294, %s644_s11   ;;  %s644_s11 = sphi %s670_s11, %s17_s11   ;;  %s640_s10 = sphi %s668_s10, %s871_s10   ;;  %s636_s9 = sphi %s666_s9, %s870_s9   ;;  %s632_s8 = sphi %s664_s8, %s869_s8   ;;  %s628_s7 = sphi %s662_s7, %s868_s7   ;;  %s624_s6 = sphi %s660_s6, %s867_s6  }
   0x7   : > { %s29_s14 = sadd.s32 1, %s640_s10  ;;  %s38_s15 = sadd.s32 1, %s632_s8 }
   0x8   : > { %p31_p0 = scmp.ge.s32.totalorder %s29_s14, 2  ;;  %p45_p1 = scmp.ne.s32.totalorder %s632_s8, %s628_s7 }
   0x9   : > { %p46_p2 = scmp.eq.s32.totalorder %s644_s11, 0  ;;  %p51_p3 = scmp.ne.s32.totalorder %s628_s7, %s624_s6 }
   0xa   : > { %s873_s14 = smov (%p31_p0, %s29_s14), 0  ;;  %p52_p5 = scmp.eq.s32.totalorder %s454_s12, 0 }
   0xb   : > { %p701_p4 = por %p46_p2, %p45_p1  ;;  %s33_s17 = ssub.s32 %s640_s10, %s873_s14 }
   0xc   : > { %p75_p6 = scmp.eq.s32.totalorder %s454_s12, 1  ;;  %p36_p7 = scmp.eq.s32.totalorder %s33_s17, 0 }
   0xd   : > { %p707_p8 = por %p52_p5, %p51_p3  ;;  %p81_p10 = scmp.eq.s32.totalorder %s455_s13, 1 }
   0xe   : > { %p711_p9 = por %p75_p6, %p45_p1  ;;  %p483_p13 = scmp.lt.s32.totalorder %s644_s11, 2 }
   0xf   : > { %s716_s20 = scalar_select %p36_p7, %s632_s8, %s38_s15  }
  0x10   : > { %p718_p11 = por %p81_p10, %p51_p3  ;;  %s101_s22 = sand.u32 1, %s632_s8  }
  0x11   : > { %s458_s23 = sshll.u32 %s101_s22, 9  ;;  %s470_s24 = sshll.u32 %s640_s10, 13 }
  0x12   : > { %s114_s27 = scalar_lea.hbm %s859_s0, %s470_s24  ;;  %s105_s28 = scalar_lea.vmem [#allocation2], %s458_s23 }
  0x13   : > { %s115_s29 = sshll.u32 %s105_s28, 4  ;;  %p731_p0 = pnand %p483_p13, %p701_p4  ;;  %s116_s29 = int_to_ptr.vmem [resolvable:$true] %s115_s29 }
  0x14   : > { %p462_p1 = scmp.ge.s32.totalorder %s644_s11, 1  ;;  %s102_s2 = scalar_lea.sflag [#allocation3], %s101_s22 }
  0x15   : > { %p538_p2 = pneg %p731_p0  ;;  %s549_s3 = scalar_lea.vmem %s116_s29, 8192 }
  0x16   : > { %p550_p3 = scmp.ne.s32.totalorder %s116_s29, %s549_s3  ;;  %s646_s4 = smov [#allocation2]  }
  0x17   : > { %s554_s5 = sshll.u32 %s646_s4, 4  ;;  %s555_s5 = int_to_ptr.vmem [resolvable:$false] %s554_s5 }
  0x18   : > { %p552_p5 = pnand %p550_p3, %p538_p2  ;;  %s556_s12 = scalar_lea.vmem %s555_s5, 16384 }
  0x19   : > { %p557_p7 = scmp.lt.s32.totalorder %s116_s29, %s555_s5  ;;  %p558_p10 = scmp.lt.s32.totalorder %s556_s12, %s549_s3 }
  0x1a   : > { %p553_p6 = pneg %p552_p5 }
  0x1b   : > { %p559_p12 = por %p558_p10, %p557_p7 }
  0x1d   : > { %p560_p4 = pnand %p559_p12, %p553_p6 }
  0x1f   : > { %563 = shalt.err (!%p560_p4)
}
  0x20   : > { %s647_s13 = smov 128   ;;  %s648_s15 = smov 8  }
  0x21   : > { %478 = dma.hbm_to_vmem [thread:$0]  (!%p731_p0), %s114_s27, 8192, %s116_s29, %s102_s2, %s647_s13, %s647_s13, %s648_s15  }
  0x22   : > { %p123_p13 = scmp.lt.s32.totalorder %s644_s11, 3 }
  0x24   : > { %p124_p2 = pnand %p462_p1, %p123_p13 }
  0x25   : > { %s744_s16 = sand.u32 (!%p124_p2), 1, %s628_s7  }
  0x26   : > { %127 = sbr.rel (%p124_p2) target bundleno = 104 (0x68), region = 24  ;;  %s463_s17 = sshll.u32 (!%p124_p2), %s744_s16, 9 }
  0x27   : > { %s130_s22 = scalar_lea.sflag (!%p124_p2), [#allocation3], %s744_s16  ;;  %s748_s23 = scalar_lea.vmem (!%p124_p2), [#allocation2], %s463_s17 }
  0x2b   : > { %615 = dma.done.wait (%p707_p8), %s130_s22, 8192  }
  0x2c   : > { %617 = vsyncadd (%p707_p8), %s130_s22, 4294959104  ;;  %v160_v0 = vld [vmem:[%s748_s23] sm:$0xff]  ;;  %v161_v1 = vld [vmem:[%s748_s23 + $0x8] sm:$0xff]  ;;  %vm336_vm0 = vcmask 1041409   ;;  %vm338_vm1 = vcmask 1042434   ;;  %vm340_vm2 = vcmask 1043459  }
  0x2d   : > { %v162_v2 = vld [vmem:[%s748_s23 + $0x10] sm:$0xff]  ;;  %v224_v3 = vadd.f32 %v161_v1, %v160_v0  ;;  %v163_v4 = vld [vmem:[%s748_s23 + $0x18] sm:$0xff]  ;;  %v168_v5 = vld [vmem:[%s748_s23 + $0x40] sm:$0xff]  ;;  %vm342_vm3 = vcmask 1044484   ;;  %vm344_vm4 = vcmask 1045509   ;;  %s464_s18 = sshll.u32 %s744_s16, 3 }
  0x2e   : > { %v169_v6 = vld [vmem:[%s748_s23 + $0x48] sm:$0xff]  ;;  %v170_v7 = vld [vmem:[%s748_s23 + $0x50] sm:$0xff]  ;;  %v164_v9 = vld [vmem:[%s748_s23 + $0x20] sm:$0xff]  ;;  %vm346_vm5 = vcmask 1046534   ;;  %vm348_vm6 = vcmask 1047559   ;;  %s466_s24 = sshll.u32 %s636_s9, 7 }
  0x2f   : > { %v225_v8 = vadd.f32 %v224_v3, %v162_v2  ;;  %v237_v10 = vadd.f32 %v169_v6, %v168_v5  ;;  %v171_v11 = vld [vmem:[%s748_s23 + $0x58] sm:$0xff]  ;;  %v176_v12 = vld [vmem:[%s748_s23 + $0x80] sm:$0xff]  ;;  %v177_v13 = vld [vmem:[%s748_s23 + $0x88] sm:$0xff]  ;;  %s151_s25 = scalar_lea.vmem [#allocation5], %s464_s18  ;;  %s371_s29 = scalar_lea.hbm %s860_s1, %s466_s24 }
  0x30   : > { %v165_v15 = vld [vmem:[%s748_s23 + $0x28] sm:$0xff]  ;;  %v178_v16 = vld [vmem:[%s748_s23 + $0x90] sm:$0xff]  ;;  %v250_v18 = vadd.f32 %v177_v13, %v176_v12  ;;  %v172_v20 = vld [vmem:[%s748_s23 + $0x60] sm:$0xff]  ;;  %s373_s26 = sshll.u32 %s151_s25, 4  ;;  %s360_s30 = scalar_lea.sflag [#allocation4], %s744_s16  ;;  %s374_s26 = int_to_ptr.vmem [resolvable:$true] %s373_s26 }
  0x31   : > { %v226_v14 = vadd.f32 %v225_v8, %v163_v4  ;;  %v238_v17 = vadd.f32 %v237_v10, %v170_v7  ;;  %v166_v19 = vld [vmem:[%s748_s23 + $0x30] sm:$0xff]  ;;  %v179_v21 = vld [vmem:[%s748_s23 + $0x98] sm:$0xff]  ;;  %v184_v23 = vld [vmem:[%s748_s23 + $0xc0] sm:$0xff]  ;;  %s564_s2 = scalar_lea.vmem %s374_s26, 128  ;;  %s649_s3 = smov [#allocation5]  }
  0x32   : > { %v185_v24 = vld [vmem:[%s748_s23 + $0xc8] sm:$0xff]  ;;  %v186_v25 = vld [vmem:[%s748_s23 + $0xd0] sm:$0xff]  ;;  %v251_v27 = vadd.f32 %v250_v18, %v178_v16  ;;  %v167_v28 = vld [vmem:[%s748_s23 + $0x38] sm:$0xff]  ;;  %p565_p8 = scmp.ne.s32.totalorder %s374_s26, %s564_s2  ;;  %s568_s4 = sshll.u32 %s649_s3, 4  ;;  %s569_s4 = int_to_ptr.vmem [resolvable:$false] %s568_s4 }
  0x33   : > { %v227_v22 = vadd.f32 %v226_v14, %v164_v9  ;;  %v239_v26 = vadd.f32 %v238_v17, %v171_v11  ;;  %v173_v29 = vld [vmem:[%s748_s23 + $0x68] sm:$0xff]  ;;  %v180_v30 = vld [vmem:[%s748_s23 + $0xa0] sm:$0xff]  ;;  %v263_v32 = vadd.f32 %v185_v24, %v184_v23  ;;  %v174_v33 = vld [vmem:[%s748_s23 + $0x70] sm:$0xff]  ;;  %s570_s5 = scalar_lea.vmem %s569_s4, 256  ;;  %p571_p1 = scmp.lt.s32.totalorder %s374_s26, %s569_s4 }
  0x34   : > { %v187_v34 = vld [vmem:[%s748_s23 + $0xd8] sm:$0xff]  ;;  %v192_v35 = vld [vmem:[%s748_s23 + $0x100] sm:$0xff]  ;;  %v252_v37 = vadd.f32 %v251_v27, %v179_v21  ;;  %v181_v38 = vld [vmem:[%s748_s23 + $0xa8] sm:$0xff]  ;;  %p566_p12 = pnand %p565_p8, %p711_p9  ;;  %p572_p3 = scmp.lt.s32.totalorder %s570_s5, %s564_s2 }
  0x35   : > { %v228_v31 = vadd.f32 %v227_v22, %v165_v15  ;;  %v240_v36 = vadd.f32 %v239_v26, %v172_v20  ;;  %v193_v39 = vld [vmem:[%s748_s23 + $0x108] sm:$0xff]  ;;  %v194_v40 = vld [vmem:[%s748_s23 + $0x110] sm:$0xff]  ;;  %v264_v42 = vadd.f32 %v263_v32, %v186_v25  ;;  %v175_v43 = vld [vmem:[%s748_s23 + $0x78] sm:$0xff] }
  0x36   : > { %v182_v44 = vld [vmem:[%s748_s23 + $0xb0] sm:$0xff]  ;;  %v188_v45 = vld [vmem:[%s748_s23 + $0xe0] sm:$0xff]  ;;  %v253_v47 = vadd.f32 %v252_v37, %v180_v30  ;;  %v276_v48 = vadd.f32 %v193_v39, %v192_v35  ;;  %v195_v49 = vld [vmem:[%s748_s23 + $0x118] sm:$0xff]  ;;  %p567_p0 = pneg %p566_p12  ;;  %p573_p5 = por %p572_p3, %p571_p1 }
  0x37   : > { %v229_v41 = vadd.f32 %v228_v31, %v166_v19  ;;  %v241_v46 = vadd.f32 %v240_v36, %v173_v29  ;;  %v200_v50 = vld [vmem:[%s748_s23 + $0x140] sm:$0xff]  ;;  %v201_v51 = vld [vmem:[%s748_s23 + $0x148] sm:$0xff]  ;;  %v265_v53 = vadd.f32 %v264_v42, %v187_v34  ;;  %v183_v54 = vld [vmem:[%s748_s23 + $0xb8] sm:$0xff] }
  0x38   : > { %v189_v55 = vld [vmem:[%s748_s23 + $0xe8] sm:$0xff]  ;;  %v202_v56 = vld [vmem:[%s748_s23 + $0x150] sm:$0xff]  ;;  %v254_v58 = vadd.f32 %v253_v47, %v181_v38  ;;  %v277_v59 = vadd.f32 %v276_v48, %v194_v40  ;;  %v289_v60 = vadd.f32 %v201_v51, %v200_v50  ;;  %v196_v62 = vld [vmem:[%s748_s23 + $0x120] sm:$0xff]  ;;  %p574_p6 = pnand %p573_p5, %p567_p0 }
  0x39   : > { %v230_v52 = vadd.f32 %v229_v41, %v167_v28  ;;  %v242_v57 = vadd.f32 %v241_v46, %v174_v33  ;;  %v190_v61 = vld [vmem:[%s748_s23 + $0xf0] sm:$0xff]  ;;  %v203_v63 = vld [vmem:[%s748_s23 + $0x158] sm:$0xff]  ;;  %v266_v1 = vadd.f32 %v265_v53, %v188_v45  ;;  %v208_v2 = vld [vmem:[%s748_s23 + $0x180] sm:$0xff] }
  0x3a   : > { %v209_v3 = vld [vmem:[%s748_s23 + $0x188] sm:$0xff]  ;;  %v210_v4 = vld [vmem:[%s748_s23 + $0x190] sm:$0xff]  ;;  %v255_v6 = vadd.f32 %v254_v58, %v182_v44  ;;  %v278_v7 = vadd.f32 %v277_v59, %v195_v49  ;;  %v290_v8 = vadd.f32 %v289_v60, %v202_v56  ;;  %v204_v10 = vld [vmem:[%s748_s23 + $0x160] sm:$0xff] }
  0x3b   : > { %v231_v0 = vrot.slane %v230_v52, 4  ;;  %v243_v5 = vadd.f32 %v242_v57, %v175_v43  ;;  %v197_v9 = vld [vmem:[%s748_s23 + $0x128] sm:$0xff]  ;;  %v267_v12 = vadd.f32 %v266_v1, %v189_v55  ;;  %v302_v13 = vadd.f32 %v209_v3, %v208_v2  ;;  %v191_v14 = vld [vmem:[%s748_s23 + $0xf8] sm:$0xff]  ;;  %v216_v16 = vld [vmem:[%s748_s23 + $0x1c0] sm:$0xff] }
  0x3c   : > { %v211_v15 = vld [vmem:[%s748_s23 + $0x198] sm:$0xff]  ;;  %v256_v18 = vadd.f32 %v255_v6, %v183_v54  ;;  %v279_v19 = vadd.f32 %v278_v7, %v196_v62  ;;  %v291_v20 = vadd.f32 %v290_v8, %v203_v63  ;;  %v198_v21 = vld [vmem:[%s748_s23 + $0x130] sm:$0xff]  ;;  %v205_v22 = vld [vmem:[%s748_s23 + $0x168] sm:$0xff] }
  0x3d   : > { %v232_v11 = vadd.f32 %v231_v0, %v230_v52  ;;  %v244_v17 = vrot.slane %v243_v5, 4  ;;  %v217_v23 = vld [vmem:[%s748_s23 + $0x1c8] sm:$0xff]  ;;  %v268_v25 = vadd.f32 %v267_v12, %v190_v61  ;;  %v303_v26 = vadd.f32 %v302_v13, %v210_v4  ;;  %v212_v27 = vld [vmem:[%s748_s23 + $0x1a0] sm:$0xff]  ;;  %v218_v28 = vld [vmem:[%s748_s23 + $0x1d0] sm:$0xff] }
  0x3e   : > { %v257_v30 = vrot.slane %v256_v18, 4  ;;  %v280_v31 = vadd.f32 %v279_v19, %v197_v9  ;;  %v292_v32 = vadd.f32 %v291_v20, %v204_v10  ;;  %v199_v33 = vld [vmem:[%s748_s23 + $0x138] sm:$0xff]  ;;  %v206_v34 = vld [vmem:[%s748_s23 + $0x170] sm:$0xff]  ;;  %v315_v38 = vadd.f32 %v217_v23, %v216_v16  ;;  %v213_v39 = vld [vmem:[%s748_s23 + $0x1a8] sm:$0xff] }
  0x3f   : > { %v233_v24 = vrot.slane %v232_v11, 2  ;;  %v245_v29 = vadd.f32 %v244_v17, %v243_v5  ;;  %v269_v36 = vadd.f32 %v268_v25, %v191_v14  ;;  %v304_v37 = vadd.f32 %v303_v26, %v211_v15  ;;  %v219_v40 = vld [vmem:[%s748_s23 + $0x1d8] sm:$0xff]  ;;  %v214_v50 = vld [vmem:[%s748_s23 + $0x1b0] sm:$0xff]  ;;  %v220_v51 = vld [vmem:[%s748_s23 + $0x1e0] sm:$0xff] }
  0x40   : > { %v258_v42 = vadd.f32 %v257_v30, %v256_v18  ;;  %v281_v43 = vadd.f32 %v280_v31, %v198_v21  ;;  %v293_v44 = vadd.f32 %v292_v32, %v205_v22  ;;  %v207_v45 = vld [vmem:[%s748_s23 + $0x178] sm:$0xff]  ;;  %v316_v49 = vadd.f32 %v315_v38, %v218_v28  ;;  %v221_v61 = vld [vmem:[%s748_s23 + $0x1e8] sm:$0xff]  ;;  %v222_v5 = vld [vmem:[%s748_s23 + $0x1f0] sm:$0xff] }
  0x41   : > { %v234_v35 = vadd.f32 %v233_v24, %v232_v11  ;;  %v246_v41 = vrot.slane %v245_v29, 2  ;;  %v270_v47 = vrot.slane %v269_v36, 4  ;;  %v305_v48 = vadd.f32 %v304_v37, %v212_v27  ;;  %v215_v60 = vld [vmem:[%s748_s23 + $0x1b8] sm:$0xff] }
  0x42   : > { %v259_v53 = vrot.slane %v258_v42, 2  ;;  %v282_v54 = vadd.f32 %v281_v43, %v199_v33  ;;  %v294_v55 = vadd.f32 %v293_v44, %v206_v34  ;;  %v317_v59 = vadd.f32 %v316_v49, %v219_v40  ;;  %v223_v13 = vld [vmem:[%s748_s23 + $0x1f8] sm:$0xff] }
  0x43   : > { %v235_v46 = vrot.slane %v234_v35, 1  ;;  %v247_v52 = vadd.f32 %v246_v41, %v245_v29  ;;  %v271_v57 = vadd.f32 %v270_v47, %v269_v36  ;;  %v306_v58 = vadd.f32 %v305_v48, %v213_v39 }
  0x44   : > { %v260_v63 = vadd.f32 %v259_v53, %v258_v42  ;;  %v283_v0 = vrot.slane %v282_v54, 4  ;;  %v295_v1 = vadd.f32 %v294_v55, %v207_v45  ;;  %v318_v4 = vadd.f32 %v317_v59, %v220_v51 }
  0x45   : > { %v236_v56 = vadd.f32 %v235_v46, %v234_v35  ;;  %v248_v62 = vrot.slane %v247_v52, 1  ;;  %v272_v2 = vrot.slane %v271_v57, 2  ;;  %v307_v3 = vadd.f32 %v306_v58, %v214_v50 }
  0x46   : > { %v261_v7 = vrot.slane %v260_v63, 1  ;;  %v284_v8 = vadd.f32 %v283_v0, %v282_v54  ;;  %v296_v9 = vrot.slane %v295_v1, 4  ;;  %v319_v12 = vadd.f32 %v318_v4, %v221_v61 }
  0x47   : > { %v249_v6 = vadd.f32 %v248_v62, %v247_v52  ;;  %v273_v10 = vadd.f32 %v272_v2, %v271_v57  ;;  %v308_v11 = vadd.f32 %v307_v3, %v215_v60 }
  0x48   : > { %v262_v14 = vadd.f32 %v261_v7, %v260_v63  ;;  %v285_v15 = vrot.slane %v284_v8, 2  ;;  %v297_v16 = vadd.f32 %v296_v9, %v295_v1  ;;  %v320_v20 = vadd.f32 %v319_v12, %v222_v5 }
  0x49   : > { %v337_v17 = vsel %vm336_vm0, %v249_v6, %v236_v56  ;;  %v274_v18 = vrot.slane %v273_v10, 1  ;;  %v309_v19 = vrot.slane %v308_v11, 4 }
  0x4a   : > { %v286_v21 = vadd.f32 %v285_v15, %v284_v8  ;;  %v298_v22 = vrot.slane %v297_v16, 2  ;;  %v339_v23 = vsel %vm338_vm1, %v262_v14, %v337_v17  ;;  %v321_v26 = vadd.f32 %v320_v20, %v223_v13 }
  0x4b   : > { %v275_v24 = vadd.f32 %v274_v18, %v273_v10  ;;  %v310_v25 = vadd.f32 %v309_v19, %v308_v11 }
  0x4c   : > { %v287_v27 = vrot.slane %v286_v21, 1  ;;  %v299_v28 = vadd.f32 %v298_v22, %v297_v16  ;;  %v322_v30 = vrot.slane %v321_v26, 4 }
  0x4d   : > { %v311_v29 = vrot.slane %v310_v25, 2  ;;  %v341_v31 = vsel %vm340_vm2, %v275_v24, %v339_v23 }
  0x4e   : > { %v288_v32 = vadd.f32 %v287_v27, %v286_v21  ;;  %v300_v33 = vrot.slane %v299_v28, 1  ;;  %v323_v35 = vadd.f32 %v322_v30, %v321_v26 }
  0x4f   : > { %v312_v34 = vadd.f32 %v311_v29, %v310_v25 }
  0x50   : > { %v301_v36 = vadd.f32 %v300_v33, %v299_v28  ;;  %v343_v37 = vsel %vm342_vm3, %v288_v32, %v341_v31  ;;  %v324_v39 = vrot.slane %v323_v35, 2 }
  0x51   : > { %v313_v38 = vrot.slane %v312_v34, 1 }
  0x52   : > { %v325_v41 = vadd.f32 %v324_v39, %v323_v35  ;;  %v345_v42 = vsel %vm344_vm4, %v301_v36, %v343_v37 }
  0x53   : > { %v314_v40 = vadd.f32 %v313_v38, %v312_v34 }
  0x54   : > { %v326_v43 = vrot.slane %v325_v41, 1 }
  0x55   : > { %v347_v44 = vsel %vm346_vm5, %v314_v40, %v345_v42 }
  0x56   : > { %v327_v45 = vadd.f32 %v326_v43, %v325_v41 }
  0x58   : > { %v349_v46 = vsel %vm348_vm6, %v327_v45, %v347_v44 }
  0x59   : > { %v357_v47 = vmul.f32 0.015625, %v349_v46 }
  0x5b   : > { %358 = vst [vmem:[%s151_s25] sm:$0xff] %v357_v47 }
  0x5c   : > { %577 = shalt.err (!%p574_p6)
}
  0x5d   : > { %s578_s9 = scalar_lea.hbm %s371_s29, 128  ;;  %s582_s15 = scalar_lea.hbm %s860_s1, 256 }
  0x5e   : > { %p579_p7 = scmp.ne.s32.totalorder %s371_s29, %s578_s9  ;;  %p583_p13 = scmp.lt.s32.totalorder %s371_s29, %s860_s1 }
  0x5f   : > { %p584_p2 = scmp.lt.s32.totalorder %s582_s15, %s578_s9 }
  0x60   : > { %p580_p10 = pnand %p579_p7, %p711_p9 }
  0x61   : > { %p585_p8 = por %p584_p2, %p583_p13 }
  0x62   : > { %p581_p4 = pneg %p580_p10 }
  0x64   : > { %p586_p12 = pnand %p585_p8, %p581_p4 }
  0x66   : > { %589 = shalt.err (!%p586_p12)
}
  0x67   : > { %473 = dma.vmem_to_hbm [thread:$0]  (%p711_p9), %s374_s26, 128, %s371_s29, %s360_s30  }
  0x68 PF: > { %s385_s22 = sand.u32 1, %s624_s6   ;;  %p866_p0 = scmp.ge.s32.totalorder %s644_s11, 2 }
  0x69   : > { %s386_s23 = scalar_lea.sflag [#allocation4], %s385_s22 }
  0x6a   : > { %p480_p1 = pnand %p866_p0, %p718_p11 }
  0x6c   : > { %p481_p3 = pneg %p480_p1 }
  0x6e   : > { %619 = dma.done.wait (%p481_p3), %s386_s23, 128  }
  0x6f   : > { %621 = vsyncadd (%p481_p3), %s386_s23, 4294967168  ;;  %s17_s11 = sadd.s32 1, %s644_s11   ;;  %s867_s6 = smov %s628_s7 }
  0x70   : > { %p14_p5 = scmp.ge.s32.totalorder %s17_s11, 4   ;;  %s868_s7 = smov %s632_s8 }
  0x71   : > { %s869_s8 = smov %s716_s20  ;;  %s870_s9 = smov %s640_s10 }
  0x72   : > { %s871_s10 = smov %s873_s14  ;;  %16 = sbr.rel (!%p14_p5) target bundleno = 6 (0x6), region = 77 }
  0x77   :  { %391 = vsyncpa [#allocation3], 1 }
  0x78   :  { %393 = vsyncpa [#allocation3 + $0x1], 1 }
  0x79   :  { %394 = vsyncpa [#allocation4], 1 }
  0x7a   :  { %396 = vsyncpa [#allocation4 + $0x1], 1 }

</bundles_post_ra>
